<compile_context>
chip_gen: v6e
topology: v6e:2x2x1
jax: 0.10.0
libtpu: 0.0.40
codegen_flags: <defaults>
</compile_context>

<pallas_src>
import functools

import jax
import jax.numpy as jnp
from jax.experimental import pallas as pl
from jax.experimental.pallas import tpu as pltpu


def _round_up(x, m):
    return ((x + m - 1) // m) * m


# ----------------------------------------------------------------------------
# Single fused kernel:
#   emb = x @ w_emb + b_emb
#   h   = relu(emb @ w1 + b1)
#   g   = softmax(h @ w2 + b2)
#   out = LayerNorm(emb + emb * g) * gamma + beta
# ----------------------------------------------------------------------------
def _fused_kernel(x_ref, w_emb_ref, b_emb_ref, w1_ref, b1_ref,
                  w2_ref, b2_ref, gamma_ref, beta_ref, o_ref,
                  *, eps, d_valid):
    # ---- InvertedEmbedding: bf16 MXU matmul, f32 accumulation --------------
    emb = jnp.dot(x_ref[...], w_emb_ref[...],
                  preferred_element_type=jnp.float32) + b_emb_ref[...]
    # Padded d_model columns of emb are exactly 0 (zero-padded weights/bias).

    # ---- VSN gating MLP layer 1 + ReLU --------------------------------------
    h = jnp.dot(emb.astype(jnp.bfloat16), w1_ref[...],
                preferred_element_type=jnp.float32) + b1_ref[...]
    h = jnp.maximum(h, 0.0)

    # ---- gating layer 2 -> masked softmax gates -----------------------------
    logits = jnp.dot(h.astype(jnp.bfloat16), w2_ref[...],
                     preferred_element_type=jnp.float32) + b2_ref[...]
    dp = logits.shape[-1]
    needs_mask = (d_valid != dp)
    if needs_mask:
        col = jax.lax.broadcasted_iota(jnp.int32, (1, dp), 1)
        mask = col < d_valid
        logits = jnp.where(mask, logits, -1e30)
    m = jnp.max(logits, axis=-1, keepdims=True)
    p = jnp.exp(logits - m)
    gates = p * pl.reciprocal(jnp.sum(p, axis=-1, keepdims=True), approx=True)

    # ---- selection + residual: y = emb + emb * gates ------------------------
    y = emb * (1.0 + gates)          # padded columns stay exactly 0

    # ---- LayerNorm over the d_valid real columns ----------------------------
    inv_d = 1.0 / d_valid
    mu = jnp.sum(y, axis=-1, keepdims=True) * inv_d       # padded cols are 0
    diff = y - mu
    sq = diff * diff
    if needs_mask:
        sq = jnp.where(mask, sq, 0.0)                     # exclude padded cols
    var = jnp.sum(sq, axis=-1, keepdims=True) * inv_d
    yn = diff * jax.lax.rsqrt(var + eps)
    o_ref[...] = (yn * gamma_ref[...] + beta_ref[...]).astype(o_ref.dtype)


# ----------------------------------------------------------------------------
# One-time parameter preparation: pad d_model / hidden to lane-dense multiples
# of 128 and pre-cast weights to bf16 (done once, not per forward call).
# ----------------------------------------------------------------------------
def prepare_params(params, weight_dtype=jnp.bfloat16):
    T, D = params["w_emb"].shape
    H = params["w1"].shape[1]
    Dp, Hp = _round_up(D, 128), _round_up(H, 128)

    def pad2(a, rows, cols):
        return jnp.pad(a, ((0, rows - a.shape[0]), (0, cols - a.shape[1])))

    return {
        "c_in": T, "d_model": D, "hidden": H, "dp": Dp, "hp": Hp,
        "w_emb": pad2(params["w_emb"], T, Dp).astype(weight_dtype),
        "b_emb": pad2(params["b_emb"], 1, Dp).astype(jnp.float32),
        "w1":    pad2(params["w1"], Dp, Hp).astype(weight_dtype),
        "b1":    pad2(params["b1"], 1, Hp).astype(jnp.float32),
        "w2":    pad2(params["w2"], Hp, Dp).astype(weight_dtype),
        "b2":    pad2(params["b2"], 1, Dp).astype(jnp.float32),
        "ln_g":  pad2(params["ln_g"], 1, Dp).astype(jnp.float32),
        "ln_b":  pad2(params["ln_b"], 1, Dp).astype(jnp.float32),
    }


def _vmem_estimate(tm, T, Dp, Hp):
    weights = 2 * (T * Dp + Dp * Hp + Hp * Dp) * 2        # bf16, double-buffered
    smalls = 2 * (4 * Dp + Hp) * 4                        # biases + LN params f32
    io = 2 * tm * (T * 2 + Dp * 4)                        # x bf16 + out f32 tiles
    inter = tm * (2 * Dp + Hp) * 4 * 2                    # emb/h/logits/y slack
    return weights + smalls + io + inter


# ----------------------------------------------------------------------------
# Forward pass mirroring EmbeddingWithSelection.forward (inference mode)
# ----------------------------------------------------------------------------
def embedding_with_selection_forward(x, prep, x_mark=None, *,
                                     eps=1e-5, tm_target=512):
    """x: (B, T, N) f32; x_mark: optional (B, T, N_mark) f32.
    Returns (B, N[+N_mark], d_model) f32."""
    xt = jnp.transpose(x, (0, 2, 1))                       # (B, N, T)
    if x_mark is not None:
        xt = jnp.concatenate([xt, jnp.transpose(x_mark, (0, 2, 1))], axis=1)
    B, Ntok, T = xt.shape
    assert T == prep["c_in"]
    D, Dp, Hp = prep["d_model"], prep["dp"], prep["hp"]
    M = B * Ntok

    # --- M tile: multiple of 8, VMEM-budgeted, >=2 parallel blocks if possible
    tm = min(tm_target, _round_up(M, 8))
    while tm > 8 and _vmem_estimate(tm, T, Dp, Hp) > 24 * 1024 * 1024:
        tm = max(8, (tm // 2 // 8) * 8)
    Mp = _round_up(M, tm)
    if Mp // tm == 1 and tm % 16 == 0:     # give v7x's 2 TensorCores work
        tm //= 2

    x2d = xt.reshape(M, T)
    if Mp != M:
        x2d = jnp.pad(x2d, ((0, Mp - M), (0, 0)))
    x2d = x2d.astype(prep["w_emb"].dtype)

    # TODO(synk): training-mode dropout (p=0.1) not implemented; eval = identity.
    # TODO(synk): if d_model*hidden ever grows too large for VMEM-resident
    # weights, fall back to a K-tiled variant.
    out = pl.pallas_call(
        functools.partial(_fused_kernel, eps=eps, d_valid=D),
        out_shape=jax.ShapeDtypeStruct((Mp, Dp), jnp.float32),
        grid_spec=pltpu.PrefetchScalarGridSpec(
            num_scalar_prefetch=0,
            grid=(Mp // tm,),
            in_specs=[
                pl.BlockSpec((tm, T), lambda i: (i, 0)),    # x tile
                pl.BlockSpec((T, Dp), lambda i: (0, 0)),    # w_emb (resident)
                pl.BlockSpec((1, Dp), lambda i: (0, 0)),    # b_emb
                pl.BlockSpec((Dp, Hp), lambda i: (0, 0)),   # w1
                pl.BlockSpec((1, Hp), lambda i: (0, 0)),    # b1
                pl.BlockSpec((Hp, Dp), lambda i: (0, 0)),   # w2
                pl.BlockSpec((1, Dp), lambda i: (0, 0)),    # b2
                pl.BlockSpec((1, Dp), lambda i: (0, 0)),    # ln gamma
                pl.BlockSpec((1, Dp), lambda i: (0, 0)),    # ln beta
            ],
            out_specs=pl.BlockSpec((tm, Dp), lambda i: (i, 0)),
        ),
        compiler_params=pltpu.CompilerParams(
            dimension_semantics=("parallel",),
            vmem_limit_bytes=32 * 1024 * 1024,
        ),
    )(x2d, prep["w_emb"], prep["b_emb"], prep["w1"], prep["b1"],
      prep["w2"], prep["b2"], prep["ln_g"], prep["ln_b"])

    return out[:M, :D].reshape(B, Ntok, D)


# ----------------------------------------------------------------------------
# Pure-JAX f32 reference for validation
# ----------------------------------------------------------------------------
def reference_forward(x, params, x_mark=None, eps=1e-5):
    xt = jnp.transpose(x, (0, 2, 1))
    if x_mark is not None:
        xt = jnp.concatenate([xt, jnp.transpose(x_mark, (0, 2, 1))], axis=1)
    emb = xt @ params["w_emb"] + params["b_emb"]
    g = jnp.maximum(emb @ params["w1"] + params["b1"], 0.0)
    g = g @ params["w2"] + params["b2"]
    gates = jax.nn.softmax(g, axis=-1)
    y = emb + emb * gates
    mu = y.mean(-1, keepdims=True)
    var = ((y - mu) ** 2).mean(-1, keepdims=True)
    return (y - mu) / jnp.sqrt(var + eps) * params["ln_g"] + params["ln_b"]


if __name__ == "__main__":
    B, T, NVAR, NMARK, DMODEL, HIDDEN = 2, 16, 4, 3, 32, 64

    key = jax.random.PRNGKey(0)
    kx, km, k0, k1, k2, k3, k4, k5 = jax.random.split(key, 8)
    x = jax.random.normal(kx, (B, T, NVAR), jnp.float32)
    x_mark = jax.random.normal(km, (B, T, NMARK), jnp.float32)

    s = 0.02
    params = {
        "w_emb": s * jax.random.normal(k0, (T, DMODEL), jnp.float32),
        "b_emb": 0.01 * jax.random.normal(k3, (1, DMODEL), jnp.float32),
        "w1": s * jax.random.normal(k1, (DMODEL, HIDDEN), jnp.float32),
        "b1": 0.01 * jax.random.normal(k4, (1, HIDDEN), jnp.float32),
        "w2": s * jax.random.normal(k2, (HIDDEN, DMODEL), jnp.float32),
        "b2": 0.01 * jax.random.normal(k5, (1, DMODEL), jnp.float32),
        "ln_g": jnp.ones((1, DMODEL), jnp.float32),
        "ln_b": jnp.zeros((1, DMODEL), jnp.float32),
    }

    prep = prepare_params(params)          # one-time pad + bf16 cast

    out = embedding_with_selection_forward(x, prep)             # x_mark=None
    out_m = embedding_with_selection_forward(x, prep, x_mark)   # with x_mark
    jax.block_until_ready(out)
    jax.block_until_ready(out_m)

    assert out.shape == (B, NVAR, DMODEL)
    assert out_m.shape == (B, NVAR + NMARK, DMODEL)

    ref = reference_forward(x, params)
    ref_m = reference_forward(x, params, x_mark)
    err = float(jnp.max(jnp.abs(out - ref)))
    err_m = float(jnp.max(jnp.abs(out_m - ref_m)))
    assert jnp.allclose(out, ref, atol=3e-2), err
    assert jnp.allclose(out_m, ref_m, atol=3e-2), err_m

    print("KERNEL_OK")
</pallas_src>

<mosaic_0001>
module attributes {stable_mosaic.version = 11 : i64} {
  func.func @_fused_kernel(%arg0: i32, %arg1: memref<8x16xbf16, #tpu.memory_space<vmem>>, %arg2: memref<16x128xbf16, #tpu.memory_space<vmem>>, %arg3: memref<1x128xf32, #tpu.memory_space<vmem>>, %arg4: memref<128x128xbf16, #tpu.memory_space<vmem>>, %arg5: memref<1x128xf32, #tpu.memory_space<vmem>>, %arg6: memref<128x128xbf16, #tpu.memory_space<vmem>>, %arg7: memref<1x128xf32, #tpu.memory_space<vmem>>, %arg8: memref<1x128xf32, #tpu.memory_space<vmem>>, %arg9: memref<1x128xf32, #tpu.memory_space<vmem>>, %arg10: memref<8x128xf32, #tpu.memory_space<vmem>>) attributes {dimension_semantics = [#tpu.dimension_semantics<parallel>], iteration_bounds = array<i64: 1>, scalar_prefetch = 0 : i64, scratch_operands = 0 : i64, tpu.core_type = #tpu.core_type<tc>, window_params = [{transform_indices = @transform_0, window_bounds = array<i64: 8, 16>}, {pipeline_mode = #tpu.pipeline_mode<synchronous>, transform_indices = @transform_1, window_bounds = array<i64: 16, 128>}, {pipeline_mode = #tpu.pipeline_mode<synchronous>, transform_indices = @transform_2, window_bounds = array<i64: 1, 128>}, {pipeline_mode = #tpu.pipeline_mode<synchronous>, transform_indices = @transform_3, window_bounds = array<i64: 128, 128>}, {pipeline_mode = #tpu.pipeline_mode<synchronous>, transform_indices = @transform_4, window_bounds = array<i64: 1, 128>}, {pipeline_mode = #tpu.pipeline_mode<synchronous>, transform_indices = @transform_5, window_bounds = array<i64: 128, 128>}, {pipeline_mode = #tpu.pipeline_mode<synchronous>, transform_indices = @transform_6, window_bounds = array<i64: 1, 128>}, {pipeline_mode = #tpu.pipeline_mode<synchronous>, transform_indices = @transform_7, window_bounds = array<i64: 1, 128>}, {pipeline_mode = #tpu.pipeline_mode<synchronous>, transform_indices = @transform_8, window_bounds = array<i64: 1, 128>}, {transform_indices = @transform_9, window_bounds = array<i64: 8, 128>}]} {
    %c0 = arith.constant 0 : index
    %c0_0 = arith.constant 0 : index
    %0 = vector.load %arg1[%c0, %c0_0] : memref<8x16xbf16, #tpu.memory_space<vmem>>, vector<8x16xbf16>
    %c0_1 = arith.constant 0 : index
    %c0_2 = arith.constant 0 : index
    %1 = vector.load %arg2[%c0_1, %c0_2] : memref<16x128xbf16, #tpu.memory_space<vmem>>, vector<16x128xbf16>
    %cst = arith.constant dense<0.000000e+00> : vector<8x128xf32>
    %2 = tpu.matmul %0, %1, %cst {dimension_numbers = #tpu.dot_dimension_numbers<[1], [0], [0], [1], [0, 0, 1, 1], [], []>} : vector<8x16xbf16>, vector<16x128xbf16>, vector<8x128xf32> -> vector<8x128xf32>
    %c0_3 = arith.constant 0 : index
    %c0_4 = arith.constant 0 : index
    %3 = vector.load %arg3[%c0_3, %c0_4] : memref<1x128xf32, #tpu.memory_space<vmem>>, vector<1x128xf32>
    %4 = vector.broadcast %3 : vector<1x128xf32> to vector<8x128xf32>
    %5 = arith.addf %2, %4 : vector<8x128xf32>
    %6 = arith.truncf %5 : vector<8x128xf32> to vector<8x128xbf16>
    %c0_5 = arith.constant 0 : index
    %c0_6 = arith.constant 0 : index
    %7 = vector.load %arg4[%c0_5, %c0_6] : memref<128x128xbf16, #tpu.memory_space<vmem>>, vector<128x128xbf16>
    %cst_7 = arith.constant dense<0.000000e+00> : vector<8x128xf32>
    %8 = tpu.matmul %6, %7, %cst_7 {dimension_numbers = #tpu.dot_dimension_numbers<[1], [0], [0], [1], [0, 0, 1, 1], [], []>} : vector<8x128xbf16>, vector<128x128xbf16>, vector<8x128xf32> -> vector<8x128xf32>
    %c0_8 = arith.constant 0 : index
    %c0_9 = arith.constant 0 : index
    %9 = vector.load %arg5[%c0_8, %c0_9] : memref<1x128xf32, #tpu.memory_space<vmem>>, vector<1x128xf32>
    %10 = vector.broadcast %9 : vector<1x128xf32> to vector<8x128xf32>
    %11 = arith.addf %8, %10 : vector<8x128xf32>
    %cst_10 = arith.constant 0.000000e+00 : f32
    %12 = vector.broadcast %cst_10 : f32 to vector<8x128xf32>
    %13 = arith.maximumf %11, %12 : vector<8x128xf32>
    %14 = arith.truncf %13 : vector<8x128xf32> to vector<8x128xbf16>
    %c0_11 = arith.constant 0 : index
    %c0_12 = arith.constant 0 : index
    %15 = vector.load %arg6[%c0_11, %c0_12] : memref<128x128xbf16, #tpu.memory_space<vmem>>, vector<128x128xbf16>
    %cst_13 = arith.constant dense<0.000000e+00> : vector<8x128xf32>
    %16 = tpu.matmul %14, %15, %cst_13 {dimension_numbers = #tpu.dot_dimension_numbers<[1], [0], [0], [1], [0, 0, 1, 1], [], []>} : vector<8x128xbf16>, vector<128x128xbf16>, vector<8x128xf32> -> vector<8x128xf32>
    %c0_14 = arith.constant 0 : index
    %c0_15 = arith.constant 0 : index
    %17 = vector.load %arg7[%c0_14, %c0_15] : memref<1x128xf32, #tpu.memory_space<vmem>>, vector<1x128xf32>
    %18 = vector.broadcast %17 : vector<1x128xf32> to vector<8x128xf32>
    %19 = arith.addf %16, %18 : vector<8x128xf32>
    %20 = tpu.iota {dimensions = array<i32: 1>} : vector<1x128xi32>
    %c32_i32 = arith.constant 32 : i32
    %21 = vector.broadcast %c32_i32 : i32 to vector<1x128xi32>
    %22 = arith.cmpi slt, %20, %21 : vector<1x128xi32>
    %cst_16 = arith.constant -1.000000e+30 : f32
    %23 = vector.shape_cast %22 : vector<1x128xi1> to vector<1x128xi1>
    %24 = vector.broadcast %23 : vector<1x128xi1> to vector<8x128xi1>
    %25 = vector.broadcast %cst_16 : f32 to vector<8x128xf32>
    %26 = arith.select %24, %19, %25 : vector<8x128xi1>, vector<8x128xf32>
    %cst_17 = arith.constant dense<0xFF800000> : vector<8xf32>
    %27 = vector.multi_reduction <maximumf>, %26, %cst_17 [1] : vector<8x128xf32> to vector<8xf32>
    %28 = vector.shape_cast %27 : vector<8xf32> to vector<8x1xf32>
    %29 = vector.broadcast %28 : vector<8x1xf32> to vector<8x128xf32>
    %30 = arith.subf %26, %29 : vector<8x128xf32>
    %31 = math.exp %30 : vector<8x128xf32>
    %cst_18 = arith.constant dense<0.000000e+00> : vector<8xf32>
    %32 = vector.multi_reduction <add>, %31, %cst_18 [1] : vector<8x128xf32> to vector<8xf32>
    %33 = vector.shape_cast %32 : vector<8xf32> to vector<8x1xf32>
    %34 = tpu.reciprocal %33 {approx = true} : vector<8x1xf32> -> vector<8x1xf32>
    %35 = vector.broadcast %34 : vector<8x1xf32> to vector<8x128xf32>
    %36 = arith.mulf %31, %35 : vector<8x128xf32>
    %cst_19 = arith.constant 1.000000e+00 : f32
    %37 = vector.broadcast %cst_19 : f32 to vector<8x128xf32>
    %38 = arith.addf %37, %36 : vector<8x128xf32>
    %39 = arith.mulf %5, %38 : vector<8x128xf32>
    %cst_20 = arith.constant dense<0.000000e+00> : vector<8xf32>
    %40 = vector.multi_reduction <add>, %39, %cst_20 [1] : vector<8x128xf32> to vector<8xf32>
    %41 = vector.shape_cast %40 : vector<8xf32> to vector<8x1xf32>
    %cst_21 = arith.constant 3.125000e-02 : f32
    %42 = vector.broadcast %cst_21 : f32 to vector<8x1xf32>
    %43 = arith.mulf %41, %42 : vector<8x1xf32>
    %44 = vector.broadcast %43 : vector<8x1xf32> to vector<8x128xf32>
    %45 = arith.subf %39, %44 : vector<8x128xf32>
    %46 = arith.mulf %45, %45 : vector<8x128xf32>
    %cst_22 = arith.constant 0.000000e+00 : f32
    %47 = vector.shape_cast %22 : vector<1x128xi1> to vector<1x128xi1>
    %48 = vector.broadcast %47 : vector<1x128xi1> to vector<8x128xi1>
    %49 = vector.broadcast %cst_22 : f32 to vector<8x128xf32>
    %50 = arith.select %48, %46, %49 : vector<8x128xi1>, vector<8x128xf32>
    %cst_23 = arith.constant dense<0.000000e+00> : vector<8xf32>
    %51 = vector.multi_reduction <add>, %50, %cst_23 [1] : vector<8x128xf32> to vector<8xf32>
    %52 = vector.shape_cast %51 : vector<8xf32> to vector<8x1xf32>
    %cst_24 = arith.constant 3.125000e-02 : f32
    %53 = vector.broadcast %cst_24 : f32 to vector<8x1xf32>
    %54 = arith.mulf %52, %53 : vector<8x1xf32>
    %cst_25 = arith.constant 9.99999974E-6 : f32
    %55 = vector.broadcast %cst_25 : f32 to vector<8x1xf32>
    %56 = arith.addf %54, %55 : vector<8x1xf32>
    %57 = math.rsqrt %56 : vector<8x1xf32>
    %58 = vector.broadcast %57 : vector<8x1xf32> to vector<8x128xf32>
    %59 = arith.mulf %45, %58 : vector<8x128xf32>
    %c0_26 = arith.constant 0 : index
    %c0_27 = arith.constant 0 : index
    %60 = vector.load %arg8[%c0_26, %c0_27] : memref<1x128xf32, #tpu.memory_space<vmem>>, vector<1x128xf32>
    %61 = vector.broadcast %60 : vector<1x128xf32> to vector<8x128xf32>
    %62 = arith.mulf %59, %61 : vector<8x128xf32>
    %c0_28 = arith.constant 0 : index
    %c0_29 = arith.constant 0 : index
    %63 = vector.load %arg9[%c0_28, %c0_29] : memref<1x128xf32, #tpu.memory_space<vmem>>, vector<1x128xf32>
    %64 = vector.broadcast %63 : vector<1x128xf32> to vector<8x128xf32>
    %65 = arith.addf %62, %64 : vector<8x128xf32>
    %c0_30 = arith.constant 0 : index
    %c0_31 = arith.constant 0 : index
    %66 = vector.load %arg10[%c0_30, %c0_31] : memref<8x128xf32, #tpu.memory_space<vmem>>, vector<8x128xf32>
    tpu.vector_store %arg10[%c0_30, %c0_31], %65 {strides = array<i32>} : memref<8x128xf32, #tpu.memory_space<vmem>>, vector<8x128xf32>,
    return
  }
  func.func @transform_0(%arg0: i32) -> (i32, i32) {
    %c0_i32 = arith.constant 0 : i32
    %c0_i32_0 = arith.constant 0 : i32
    return %arg0, %c0_i32 : i32, i32
  }
  func.func @transform_1(%arg0: i32) -> (i32, i32) {
    %c0_i32 = arith.constant 0 : i32
    %c0_i32_0 = arith.constant 0 : i32
    %c0_i32_1 = arith.constant 0 : i32
    return %c0_i32, %c0_i32_0 : i32, i32
  }
  func.func @transform_2(%arg0: i32) -> (i32, i32) {
    %c0_i32 = arith.constant 0 : i32
    %c0_i32_0 = arith.constant 0 : i32
    %c0_i32_1 = arith.constant 0 : i32
    return %c0_i32, %c0_i32_0 : i32, i32
  }
  func.func @transform_3(%arg0: i32) -> (i32, i32) {
    %c0_i32 = arith.constant 0 : i32
    %c0_i32_0 = arith.constant 0 : i32
    %c0_i32_1 = arith.constant 0 : i32
    return %c0_i32, %c0_i32_0 : i32, i32
  }
  func.func @transform_4(%arg0: i32) -> (i32, i32) {
    %c0_i32 = arith.constant 0 : i32
    %c0_i32_0 = arith.constant 0 : i32
    %c0_i32_1 = arith.constant 0 : i32
    return %c0_i32, %c0_i32_0 : i32, i32
  }
  func.func @transform_5(%arg0: i32) -> (i32, i32) {
    %c0_i32 = arith.constant 0 : i32
    %c0_i32_0 = arith.constant 0 : i32
    %c0_i32_1 = arith.constant 0 : i32
    return %c0_i32, %c0_i32_0 : i32, i32
  }
  func.func @transform_6(%arg0: i32) -> (i32, i32) {
    %c0_i32 = arith.constant 0 : i32
    %c0_i32_0 = arith.constant 0 : i32
    %c0_i32_1 = arith.constant 0 : i32
    return %c0_i32, %c0_i32_0 : i32, i32
  }
  func.func @transform_7(%arg0: i32) -> (i32, i32) {
    %c0_i32 = arith.constant 0 : i32
    %c0_i32_0 = arith.constant 0 : i32
    %c0_i32_1 = arith.constant 0 : i32
    return %c0_i32, %c0_i32_0 : i32, i32
  }
  func.func @transform_8(%arg0: i32) -> (i32, i32) {
    %c0_i32 = arith.constant 0 : i32
    %c0_i32_0 = arith.constant 0 : i32
    %c0_i32_1 = arith.constant 0 : i32
    return %c0_i32, %c0_i32_0 : i32, i32
  }
  func.func @transform_9(%arg0: i32) -> (i32, i32) {
    %c0_i32 = arith.constant 0 : i32
    %c0_i32_0 = arith.constant 0 : i32
    return %arg0, %c0_i32 : i32, i32
  }
}

</mosaic_0001>

<bundles_post_ra>
// kernel: tpu_custom_call.1
= control target key start
LH: loop header
LB: loop body
LE: loop exit
PB: predicated region body
PF: predicated region fallthrough
CT: control target
= control target key end

     0   :  { %14 = vsyncpa [#allocation3], 0  ;;  %s784_s0 = inlined_call_operand.hbm [shape: bf16[8,16], index: 0, kind: input, shape index: {}]   ;;  %s785_s1 = inlined_call_operand.hbm [shape: bf16[16,128], index: 1, kind: input, shape index: {}]   ;;  %s786_s2 = inlined_call_operand.vmem [shape: f32[1,128], index: 2, kind: input, shape index: {}]   ;;  %s787_s3 = inlined_call_operand.hbm [shape: bf16[128,128], index: 3, kind: input, shape index: {}]   ;;  %s788_s4 = inlined_call_operand.vmem [shape: f32[1,128], index: 4, kind: input, shape index: {}]   ;;  %s789_s5 = inlined_call_operand.hbm [shape: bf16[128,128], index: 5, kind: input, shape index: {}]   ;;  %s790_s6 = inlined_call_operand.vmem [shape: f32[1,128], index: 6, kind: input, shape index: {}]   ;;  %s791_s7 = inlined_call_operand.vmem [shape: f32[1,128], index: 7, kind: input, shape index: {}]   ;;  %s792_s8 = inlined_call_operand.vmem [shape: f32[1,128], index: 8, kind: input, shape index: {}]   ;;  %s793_s9 = inlined_call_operand.hbm [shape: f32[8,128], index: 9, kind: output, shape index: {}]  }
   0x1   :  { %15 = vsyncpa [#allocation6], 0 }
   0x2   :  { %16 = vsyncpa [#allocation9], 0 }
   0x3   :  { %17 = vsyncpa [#allocation4], 0  ;;  %s664_s30 = smov [#allocation5]  }
   0x4   :  { %s33_s10 = sshll.u32 %s664_s30, 4  ;;  %s34_s10 = int_to_ptr.vmem [resolvable:$true] %s33_s10 }
   0x5   :  { %s564_s11 = scalar_lea.vmem %s34_s10, 128  ;;  %p569_p1 = scmp.lt.s32.totalorder %s34_s10, %s34_s10 }
   0x6   :  { %p565_p0 = scmp.ne.s32.totalorder %s34_s10, %s564_s11  ;;  %p570_p2 = scmp.lt.s32.totalorder %s564_s11, %s564_s11 }
   0x8   :  { %p571_p3 = por %p570_p2, %p569_p1 }
   0xa   :  { %p572_p4 = pnand %p571_p3, %p565_p0 }
   0xc   :  { %575 = shalt.err (!%p572_p4)
}
   0xd   :  { %s665_s12 = smov 64   ;;  %s666_s13 = smov 4  }
   0xe   :  { %39 = dma.hbm_to_vmem [thread:$0]  %s785_s1, 128, %s34_s10, [#allocation6], %s665_s12, %s665_s12, %s666_s13  }
   0xf   :  { %s667_s16 = smov [#allocation2]   ;;  %s668_s18 = smov [#allocation7]  }
  0x10   :  { %s24_s17 = sshll.u32 %s667_s16, 4  ;;  %s47_s19 = sshll.u32 %s668_s18, 4  ;;  %s25_s17 = int_to_ptr.vmem [resolvable:$true] %s24_s17  ;;  %s48_s19 = int_to_ptr.vmem [resolvable:$true] %s47_s19 }
  0x11   :  { %s584_s20 = scalar_lea.vmem %s25_s17, 64  ;;  %p589_p6 = scmp.lt.s32.totalorder %s25_s17, %s25_s17 }
  0x12   :  { %p585_p5 = scmp.ne.s32.totalorder %s25_s17, %s584_s20  ;;  %p590_p7 = scmp.lt.s32.totalorder %s584_s20, %s584_s20 }
  0x14   :  { %p591_p8 = por %p590_p7, %p589_p6 }
  0x16   :  { %p592_p9 = pnand %p591_p8, %p585_p5 }
  0x18   :  { %595 = shalt.err (!%p592_p9)
}
  0x19   :  { %27 = dma.hbm_to_vmem [thread:$0]  %s784_s0, 64, %s25_s17, [#allocation3]  }
  0x1a   :  { %s604_s23 = scalar_lea.vmem %s48_s19, 1024  ;;  %p609_p11 = scmp.lt.s32.totalorder %s48_s19, %s48_s19 }
  0x1b   :  { %p605_p10 = scmp.ne.s32.totalorder %s48_s19, %s604_s23  ;;  %p610_p12 = scmp.lt.s32.totalorder %s604_s23, %s604_s23 }
  0x1d   :  { %p611_p13 = por %p610_p12, %p609_p11 }
  0x1f   :  { %p612_p0 = pnand %p611_p13, %p605_p10 }
  0x21   :  { %615 = shalt.err (!%p612_p0)
}
  0x22   :  { %53 = dma.hbm_to_vmem [thread:$0]  %s787_s3, 1024, %s48_s19, [#allocation6], %s665_s12, %s665_s12, %s666_s13  }
  0x23   :  { %s669_s25 = smov [#allocation8]  }
  0x24   :  { %s61_s26 = sshll.u32 %s669_s25, 4  ;;  %s62_s26 = int_to_ptr.vmem [resolvable:$true] %s61_s26 }
  0x25   :  { %s624_s27 = scalar_lea.vmem %s62_s26, 1024  ;;  %p629_p2 = scmp.lt.s32.totalorder %s62_s26, %s62_s26 }
  0x26   :  { %p625_p1 = scmp.ne.s32.totalorder %s62_s26, %s624_s27  ;;  %p630_p3 = scmp.lt.s32.totalorder %s624_s27, %s624_s27 }
  0x28   :  { %p631_p4 = por %p630_p3, %p629_p2 }
  0x2a   :  { %p632_p5 = pnand %p631_p4, %p625_p1 }
  0x2c   :  { %635 = shalt.err (!%p632_p5)
}
  0x2d   :  { %67 = dma.hbm_to_vmem [thread:$0]  %s789_s5, 1024, %s62_s26, [#allocation9], %s665_s12, %s665_s12, %s666_s13  }
  0x2e   :  { %656 = dma.done.wait [#allocation3], 64  }
  0x2f   :  { %657 = vsyncadd [#allocation3], 4294967232 }
  0x30   :  { %658 = dma.done.wait [#allocation6], 1152  }
  0x31   :  { %659 = vsyncadd [#allocation6], 4294966144 }
  0x32   :  { %660 = dma.done.wait [#allocation9], 1024  }
  0x33   :  { %661 = vsyncadd [#allocation9], 4294966272  ;;  %v670_v0 = vmov 0.0   ;;  %vm671_vm0 = vmmov 0   ;;  %v533_v1 = vld [vmem:[#allocation5] sm:$0xff]   ;;  %vm103_vm1 = vcmask 130048   ;;  %v372_v34 = vlaneseq }
  0x34   :  { %478 = vmatprep.subr.bf16.mxu0 %v670_v0  ;;  %480 = vmatprep.mubr.msk.bf16.mxu0 %vm671_vm0, %v670_v0  ;;  %v87_v2 = vld [vmem:[#allocation2] sm:$0xf]  ;;  %v534_v3 = vld [vmem:[#allocation7 + $0x38] sm:$0xff]   ;;  %v536_v5 = vld [vmem:[#allocation7 + $0x28] sm:$0xff]   ;;  %s672_s13 = smov [#allocation10]  }
  0x35   :  { %484 = vmatprep.subr.bf16.mxu1 %v670_v0  ;;  %500 = vmatprep.mubr.msk.bf16.mxu1 %vm671_vm0, %v670_v0  ;;  %v535_v4 = vld [vmem:[#allocation7 + $0x30] sm:$0xff]   ;;  %v537_v6 = vld [vmem:[#allocation7 + $0x20] sm:$0xff]   ;;  %v538_v7 = vld [vmem:[#allocation7 + $0x18] sm:$0xff]   ;;  %v373_v35 = vand.u32 127, %v372_v34  ;;  %s424_s14 = sshll.u32 %s672_s13, 4  ;;  %s425_s14 = int_to_ptr.vmem [resolvable:$true] %s424_s14 }
  0x36   :  { %479 = vmatpush3.bf16.msra.mxu0 %v533_v1  ;;  %485 = vmatpush3.bf16.msra.mxu1 %v534_v3  ;;  %v539_v8 = vld [vmem:[#allocation7 + $0x10] sm:$0xff]   ;;  %v540_v9 = vld [vmem:[#allocation7 + $0x8] sm:$0xff]   ;;  %v541_v10 = vld [vmem:[#allocation7] sm:$0xff]   ;;  %s636_s15 = scalar_lea.vmem %s425_s14, 128  ;;  %p641_p7 = scmp.lt.s32.totalorder %s425_s14, %s425_s14 }
  0x37   :  { %504 = vmatprep.subr.bf16.mxu0 %v670_v0  ;;  %486 = vmatprep.subr.bf16.mxu1 %v670_v0  ;;  %v542_v11 = vld [vmem:[#allocation8 + $0x38] sm:$0xff]   ;;  %v543_v12 = vld [vmem:[#allocation8 + $0x30] sm:$0xff]   ;;  %v544_v13 = vld [vmem:[#allocation8 + $0x28] sm:$0xff]   ;;  %vm374_vm2 = vcmp.lt.s32.totalorder %v373_v35, 32  ;;  %p637_p6 = scmp.ne.s32.totalorder %s425_s14, %s636_s15  ;;  %p642_p8 = scmp.lt.s32.totalorder %s636_s15, %s636_s15 }
  0x38   :  { %v545_v14 = vld [vmem:[#allocation8 + $0x20] sm:$0xff]   ;;  %v546_v15 = vld [vmem:[#allocation8 + $0x18] sm:$0xff]   ;;  %v547_v16 = vld [vmem:[#allocation8 + $0x10] sm:$0xff]  }
  0x39   :  { %481 = vmatmul.mubr.msk.bf16.vlgmr.msra.gmra.mxu0 %vm103_vm1, %v87_v2  ;;  %v435_v17 = vld [vmem:[%s786_s2] ss:$0 sm:$0xff]  ;;  %v548_v24 = vld [vmem:[#allocation8 + $0x8] sm:$0xff]   ;;  %v549_v25 = vld [vmem:[#allocation8] sm:$0xff]   ;;  %p643_p9 = por %p642_p8, %p641_p7 }
  0x3a   :  { %520 = vmatprep.mubr.msk.bf16.mxu0 %vm671_vm0, %v670_v0  ;;  %487 = vmatpush3.bf16.msra.mxu1 %v535_v4  ;;  %v438_v26 = vld [vmem:[%s788_s4] ss:$0 sm:$0xff] }
  0x3b   :  { %488 = vmatprep.subr.bf16.mxu1 %v670_v0  ;;  %505 = vmatpush3.bf16.msra.mxu0 %v542_v11  ;;  %v447_v36 = vld [vmem:[%s790_s6] ss:$0 sm:$0xff]  ;;  %p644_p10 = pnand %p643_p9, %p637_p6 }
  0x3c   :  { %506 = vmatprep.subr.bf16.mxu0 %v670_v0  ;;  %v456_v61 = vld [vmem:[%s791_s7] ss:$0 sm:$0xff] }
  0x3d   :  { %v457_v63 = vld [vmem:[%s792_s8] ss:$0 sm:$0xff] }
  0x3e   :  { %489 = vmatpush3.bf16.msra.mxu1 %v536_v5 }
  0x3f   :  { %490 = vmatprep.subr.bf16.mxu1 %v670_v0  ;;  %507 = vmatpush3.bf16.msra.mxu0 %v543_v12 }
  0x40   :  { %508 = vmatprep.subr.bf16.mxu0 %v670_v0 }
  0x42   :  { %491 = vmatpush3.bf16.msra.mxu1 %v537_v6 }
  0x43   :  { %492 = vmatprep.subr.bf16.mxu1 %v670_v0  ;;  %509 = vmatpush3.bf16.msra.mxu0 %v544_v13 }
  0x44   :  { %510 = vmatprep.subr.bf16.mxu0 %v670_v0 }
  0x46   :  { %493 = vmatpush3.bf16.msra.mxu1 %v538_v7 }
  0x47   :  { %494 = vmatprep.subr.bf16.mxu1 %v670_v0  ;;  %511 = vmatpush3.bf16.msra.mxu0 %v545_v14 }
  0x48   :  { %512 = vmatprep.subr.bf16.mxu0 %v670_v0 }
  0x4a   :  { %495 = vmatpush3.bf16.msra.mxu1 %v539_v8 }
  0x4b   :  { %496 = vmatprep.subr.bf16.mxu1 %v670_v0  ;;  %513 = vmatpush3.bf16.msra.mxu0 %v546_v15 }
  0x4c   :  { %514 = vmatprep.subr.bf16.mxu0 %v670_v0 }
  0x4e   :  { %497 = vmatpush3.bf16.msra.mxu1 %v540_v9 }
  0x4f   :  { %498 = vmatprep.subr.bf16.mxu1 %v670_v0  ;;  %515 = vmatpush3.bf16.msra.mxu0 %v547_v16 }
  0x50   :  { %516 = vmatprep.subr.bf16.mxu0 %v670_v0 }
  0x52   :  { %499 = vmatpush3.bf16.msra.mxu1 %v541_v10 }
  0x53   :  { %517 = vmatpush3.bf16.msra.mxu0 %v548_v24 }
  0x54   :  { %518 = vmatprep.subr.bf16.mxu0 %v670_v0 }
  0x57   :  { %519 = vmatpush3.bf16.msra.mxu0 %v549_v25 }
  0xf9   :  { %v141_v18 = vpop.f32.mrf.mxu0 }
  0xfa   :  { %v142_v19 = vadd.f32 %v435_v17, %v141_v18 }
  0xfb   :  { %v482_v20 = vpop.f32.mrf.mxu0 }
  0xfc   :  { %v147_v21 = vpack.c.bf16 %v142_v19, %v142_v19 }
  0xfd   :  { %v144_v22 = vpop.f32.mrf.mxu0 }
  0xfe   :  { %501 = vmatmul.mubr.bf16.vlgmr.msra.gmra.mxu1 %v147_v21 }
  0xff   :  { %v483_v23 = vpop.f32.mrf.mxu0 }
 0x1be   :  { %v253_v27 = vpop.f32.mrf.mxu1 }
 0x1bf   :  { %v254_v28 = vadd.f32 %v438_v26, %v253_v27 }
 0x1c0   :  { %v502_v29 = vpop.f32.mrf.mxu1 }
 0x1c1   :  { %v259_v30 = vmax.f32 %v254_v28, 0.0 }
 0x1c2   :  { %v256_v31 = vpop.f32.mrf.mxu1 }
 0x1c3   :  { %v260_v32 = vpack.c.bf16 %v259_v30, %v259_v30 }
 0x1c4   :  { %v503_v33 = vpop.f32.mrf.mxu1 }
 0x1c5   :  { %521 = vmatmul.mubr.bf16.vlgmr.msra.gmra.mxu0 %v260_v32 }
 0x285   :  { %v366_v37 = vpop.f32.mrf.mxu0 }
 0x286   :  { %v367_v38 = vadd.f32 %v447_v36, %v366_v37 }
 0x287   :  { %v522_v39 = vpop.f32.mrf.mxu0 }
 0x288   :  { %v377_v40 = vsel %vm374_vm2, %v367_v38, -1e+30 }
 0x289   :  { %378 = vmax.xlane.f32.xlu0 %v377_v40  ;;  %v369_v41 = vpop.f32.mrf.mxu0 }
 0x28b   :  { %v523_v42 = vpop.f32.mrf.mxu0 }
 0x312   :  { %v379_v43 = vpop.xlane.xlu0 %378 }
 0x313   :  { %v380_v44 = vsub.f32 %v377_v40, %v379_v43 }
 0x315   :  { %v381_v45 = vmul.f32 1.442695, %v380_v44 }
 0x317   :  { %550 = vpow2.f32 %v381_v45 }
 0x324   :  { %v551_v46 = vpop.eup %550 }
 0x325   :  { %383 = vadd.xlane.f32.xlu0 %v551_v46 }
 0x3ae   :  { %v384_v47 = vpop.xlane.xlu0 %383 }
 0x3af   :  { %552 = vrcp.f32 %v384_v47 }
 0x3bc   :  { %v553_v48 = vpop.eup %552 }
 0x3bd   :  { %v386_v49 = vmul.f32 %v553_v48, %v551_v46 }
 0x3bf   :  { %v387_v50 = vadd.f32 1.0, %v386_v49 }
 0x3c1   :  { %v388_v51 = vmul.f32 %v387_v50, %v142_v19 }
 0x3c3   :  { %389 = vadd.xlane.f32.xlu1 %v388_v51 }
 0x44c   :  { %v390_v52 = vpop.xlane.xlu1 %389 }
 0x44d   :  { %v391_v53 = vmul.f32 0.03125, %v390_v52 }
 0x44f   :  { %v392_v54 = vsub.f32 %v388_v51, %v391_v53 }
 0x451   :  { %v393_v55 = vmul.f32 %v392_v54, %v392_v54 }
 0x453   :  { %v394_v56 = vsel %vm374_vm2, %v393_v55, 0.0 }
 0x454   :  { %395 = vadd.xlane.f32.xlu1 %v394_v56 }
 0x4dd   :  { %v396_v57 = vpop.xlane.xlu1 %395 }
 0x4de   :  { %v397_v58 = vmul.f32 0.03125, %v396_v57 }
 0x4e0   :  { %v398_v59 = vadd.f32 1e-05, %v397_v58 }
 0x4e2   :  { %554 = vrsqrt.f32 %v398_v59 }
 0x4ef   :  { %v555_v60 = vpop.eup %554 }
 0x4f0   :  { %v400_v62 = vmul.f32 %v555_v60, %v392_v54 }
 0x4f2   :  { %v408_v0 = vmul.f32 %v456_v61, %v400_v62 }
 0x4f4   :  { %v416_v1 = vadd.f32 %v457_v63, %v408_v0 }
 0x4f6   :  { %417 = vst [vmem:[#allocation10] sm:$0xff] %v416_v1 }
 0x4f7   :  { %647 = shalt.err (!%p644_p10)
}
 0x4f8   :  { %427 = dma.vmem_to_hbm [thread:$0]  %s425_s14, 128, %s793_s9, [#allocation4]  }
 0x4f9   :  { %662 = dma.done.wait [#allocation4], 128  }
 0x4fa   :  { %663 = vsyncadd [#allocation4], 4294967168 }
 0x4fb   :  { %431 = vsyncpa [#allocation3], 1 }
 0x4fc   :  { %432 = vsyncpa [#allocation6], 1 }
 0x4fd   :  { %433 = vsyncpa [#allocation9], 1 }
 0x4fe   :  { %434 = vsyncpa [#allocation4], 1 }

</bundles_post_ra>
